<compile_context>
chip_gen: v7x
topology: tpu7x:2x2x1
jax: 0.10.0
libtpu: 0.0.40
codegen_flags: <defaults>
</compile_context>

<pallas_src>
import functools

import jax
import jax.numpy as jnp
from jax.experimental import pallas as pl
from jax.experimental.pallas import tpu as pltpu


def _yolo_decode_kernel(anc_ref, gxy_ref, x_ref, o_ref, y_scr, *, img_size):
    """Decode one (batch, anchor, HW-tile) block.

    anc_ref : (A, 2)  f32 SMEM  -- [anchor_w*img_size, anchor_h*img_size]
    gxy_ref : (2, T)  f32 VMEM  -- img_size*(grid_x+0.5), img_size*(grid_y+0.5)
    x_ref   : (C5, T) VMEM      -- raw logits tile (native dtype)
    o_ref   : (T, C5) VMEM      -- decoded output tile (lane-minor = 5+C)
    y_scr   : (C5, T) f32 VMEM scratch
    """
    a = pl.program_id(1)                       # anchor index from the grid
    x = x_ref[...].astype(jnp.float32)         # upcast per tile (compute in f32)
    gxy = gxy_ref[...]                         # (2, T)
    half = 0.5 * img_size                      # Python float -> folded constant

    # rows 0:2 -> img_size*sigmoid(txy) + img_size*grid
    #           = half*tanh(0.5*x) + img_size*(grid + 0.5)   (exact identity)
    y_scr[0:2, :] = half * jnp.tanh(0.5 * x[0:2, :]) + gxy
    # rows 2:4 -> img_size*anchor*exp(twh); anchor*img_size prefolded in SMEM
    y_scr[2:3, :] = jnp.exp(x[2:3, :]) * anc_ref[a, 0]
    y_scr[3:4, :] = jnp.exp(x[3:4, :]) * anc_ref[a, 1]
    # rows 4:  -> sigmoid(obj / class logits), unscaled
    y_scr[4:, :] = 0.5 * jnp.tanh(0.5 * x[4:, :]) + 0.5

    # Single XLU transpose + one store per tile; layout transform stays fused.
    o_ref[...] = y_scr[...].T.astype(o_ref.dtype)


def yolo_layer_forward(x_nchw, anchors, num_classes, img_size,
                       *, max_tile=1024, out_dtype=None):
    """JAX/Pallas equivalent of YOLOLayer.forward(x, targets=None) `output`."""
    n, c, h, w = x_nchw.shape
    num_anchors = len(anchors)
    c5 = num_classes + 5
    assert c == num_anchors * c5, "channel dim must be num_anchors*(num_classes+5)"
    hw = h * w
    if out_dtype is None:
        out_dtype = x_nchw.dtype

    # HW tile: full extent if small, else a multiple of 128 (tail tile handled
    # by Pallas partial-block masking).
    tile = hw if hw <= max_tile else max_tile
    num_tiles = pl.cdiv(hw, tile)

    # Free view: NCHW (n, A*C5, h, w) -> (n, A, C5, HW); HW lands on lanes.
    xk = x_nchw.reshape(n, num_anchors, c5, hw)

    # Host-precomputed grid bias with img_size and the sigmoid's +0.5 folded in.
    col = jnp.arange(hw, dtype=jnp.int32)
    gxy = float(img_size) * (jnp.stack([(col % w).astype(jnp.float32),
                                        (col // w).astype(jnp.float32)],
                                       axis=0) + 0.5)          # (2, HW) f32

    # Per-anchor scale (anchor * img_size), read as scalars from SMEM.
    anc = jnp.array([[float(aw) * float(img_size), float(ah) * float(img_size)]
                     for aw, ah in anchors], dtype=jnp.float32)  # (A, 2)

    kernel = functools.partial(_yolo_decode_kernel, img_size=float(img_size))

    out = pl.pallas_call(
        kernel,
        out_shape=jax.ShapeDtypeStruct((n, num_anchors, hw, c5), out_dtype),
        grid=(n, num_anchors, num_tiles),
        in_specs=[
            # anchors: whole (A, 2) array resident in SMEM
            pl.BlockSpec(memory_space=pltpu.MemorySpace.SMEM),
            # grid bias: (2, T) tile, shared across batch / anchor steps
            pl.BlockSpec((2, tile), lambda b, a, t: (0, t)),
            # logits: (C5, T) tile per (batch, anchor, HW-tile)
            pl.BlockSpec((None, None, c5, tile), lambda b, a, t: (b, a, 0, t)),
        ],
        out_specs=pl.BlockSpec((None, None, tile, c5),
                               lambda b, a, t: (b, a, t, 0)),
        scratch_shapes=[pltpu.VMEM((c5, tile), jnp.float32)],
        compiler_params=pltpu.CompilerParams(
            dimension_semantics=("parallel", "parallel", "parallel")),
    )(anc, gxy, xk)

    # (n, A, HW, C5) -> (n, A*HW, 5+C): contiguous reshape, no HBM copy.
    return out.reshape(n, num_anchors * hw, c5)


def yolo_layer_reference(x_nchw, anchors, num_classes, img_size):
    """Pure-JAX reference mirroring the PyTorch forward (targets=None)."""
    n, c, h, w = x_nchw.shape
    A = len(anchors)
    c5 = num_classes + 5
    xr = x_nchw.reshape(n, A, c5, h, w).transpose(0, 1, 3, 4, 2)   # (n,A,h,w,c5)
    bbox_xy = jax.nn.sigmoid(xr[..., :2])
    bbox_wh = jnp.exp(xr[..., 2:4])
    obj_conf = jax.nn.sigmoid(xr[..., 4])
    class_conf = jax.nn.sigmoid(xr[..., 5:])
    grid_x = jnp.tile(jnp.arange(w, dtype=jnp.float32), (h, 1)).reshape(1, 1, h, w)
    grid_y = jnp.tile(jnp.arange(h, dtype=jnp.float32), (w, 1)).T.reshape(1, 1, h, w)
    anchor_w = jnp.array([a_w for a_w, _ in anchors], jnp.float32).reshape(1, A, 1, 1)
    anchor_h = jnp.array([a_h for _, a_h in anchors], jnp.float32).reshape(1, A, 1, 1)
    px = bbox_xy[..., 0] + grid_x
    py = bbox_xy[..., 1] + grid_y
    pw = bbox_wh[..., 0] * anchor_w
    ph = bbox_wh[..., 1] * anchor_h
    pred_boxes = jnp.stack([px, py, pw, ph], axis=-1)
    output = jnp.concatenate(
        [pred_boxes.reshape(n, -1, 4) * img_size,
         obj_conf.reshape(n, -1, 1),
         class_conf.reshape(n, -1, num_classes)], axis=-1)
    return output


if __name__ == "__main__":
    # Small deterministic config consistent with the module.
    anchors = [(1.5, 2.0), (2.5, 3.5), (4.0, 5.0)]
    num_classes = 3
    img_size = 64.0
    n, h, w = 2, 16, 16
    c = len(anchors) * (num_classes + 5)          # 3 * 8 = 24

    key = jax.random.PRNGKey(0)
    x = jax.random.normal(key, (n, c, h, w), dtype=jnp.float32)

    ref = yolo_layer_reference(x, anchors, num_classes, img_size)

    # f32 I/O path: exact parity with the PyTorch module.
    out = jax.block_until_ready(yolo_layer_forward(x, anchors, num_classes, img_size))
    assert out.shape == (n, len(anchors) * h * w, num_classes + 5)
    assert out.dtype == jnp.float32
    assert jnp.allclose(out, ref, atol=1e-4, rtol=1e-4), "f32 mismatch vs reference"

    # bf16 I/O path: halves HBM bytes (compute stays f32 in-kernel).
    out_bf16 = jax.block_until_ready(
        yolo_layer_forward(x.astype(jnp.bfloat16), anchors, num_classes, img_size))
    assert out_bf16.dtype == jnp.bfloat16
    assert jnp.allclose(out_bf16.astype(jnp.float32), ref, atol=0.5, rtol=0.06), \
        "bf16 mismatch vs reference"

    print("KERNEL_OK")
</pallas_src>

<mosaic_0001>
module attributes {stable_mosaic.version = 11 : i64} {
  func.func @_yolo_decode_kernel(%arg0: i32, %arg1: i32, %arg2: i32, %arg3: memref<3x2xf32, #tpu.memory_space<smem>>, %arg4: memref<2x256xf32, #tpu.memory_space<vmem>>, %arg5: memref<1x1x8x256xf32, #tpu.memory_space<vmem>>, %arg6: memref<1x1x256x8xf32, #tpu.memory_space<vmem>>, %arg7: memref<8x256xf32, #tpu.memory_space<vmem>>) attributes {dimension_semantics = [#tpu.dimension_semantics<parallel>, #tpu.dimension_semantics<parallel>, #tpu.dimension_semantics<parallel>], iteration_bounds = array<i64: 2, 3, 1>, scalar_prefetch = 0 : i64, scratch_operands = 1 : i64, tpu.core_type = #tpu.core_type<tc>, window_params = [{transform_indices = @transform_0, window_bounds = array<i64: 3, 2>}, {transform_indices = @transform_1, window_bounds = array<i64: 2, 256>}, {transform_indices = @transform_2, window_bounds = array<i64: 1, 1, 8, 256>}, {transform_indices = @transform_3, window_bounds = array<i64: 1, 1, 256, 8>}]} {
    %c0 = arith.constant 0 : index
    %c0_0 = arith.constant 0 : index
    %c0_1 = arith.constant 0 : index
    %c0_2 = arith.constant 0 : index
    %0 = vector.load %arg5[%c0, %c0_0, %c0_1, %c0_2] : memref<1x1x8x256xf32, #tpu.memory_space<vmem>>, vector<1x1x8x256xf32>
    %1 = vector.shape_cast %0 : vector<1x1x8x256xf32> to vector<8x256xf32>
    %c0_3 = arith.constant 0 : index
    %c0_4 = arith.constant 0 : index
    %2 = vector.load %arg4[%c0_3, %c0_4] : memref<2x256xf32, #tpu.memory_space<vmem>>, vector<2x256xf32>
    %3 = vector.extract_strided_slice %1 {offsets = [0, 0], sizes = [2, 256], strides = [1, 1]} : vector<8x256xf32> to vector<2x256xf32>
    %cst = arith.constant 5.000000e-01 : f32
    %4 = vector.broadcast %cst : f32 to vector<2x256xf32>
    %5 = arith.mulf %4, %3 : vector<2x256xf32>
    %6 = math.tanh %5 : vector<2x256xf32>
    %cst_5 = arith.constant 3.200000e+01 : f32
    %7 = vector.broadcast %cst_5 : f32 to vector<2x256xf32>
    %8 = arith.mulf %7, %6 : vector<2x256xf32>
    %9 = arith.addf %8, %2 : vector<2x256xf32>
    %c0_6 = arith.constant 0 : index
    %c0_7 = arith.constant 0 : index
    %10 = vector.load %arg7[%c0_6, %c0_7] : memref<8x256xf32, #tpu.memory_space<vmem>>, vector<2x256xf32>
    tpu.vector_store %arg7[%c0_6, %c0_7], %9 {strides = array<i32>} : memref<8x256xf32, #tpu.memory_space<vmem>>, vector<2x256xf32>,
    %11 = vector.extract_strided_slice %1 {offsets = [2, 0], sizes = [1, 256], strides = [1, 1]} : vector<8x256xf32> to vector<1x256xf32>
    %12 = math.exp %11 : vector<1x256xf32>
    %13 = arith.index_cast %arg1 : i32 to index
    %c0_8 = arith.constant 0 : index
    %14 = memref.load %arg3[%13, %c0_8] : memref<3x2xf32, #tpu.memory_space<smem>>
    %15 = vector.broadcast %14 : f32 to vector<1x256xf32>
    %16 = arith.mulf %12, %15 : vector<1x256xf32>
    %c2 = arith.constant 2 : index
    %c0_9 = arith.constant 0 : index
    %17 = vector.load %arg7[%c2, %c0_9] : memref<8x256xf32, #tpu.memory_space<vmem>>, vector<1x256xf32>
    tpu.vector_store %arg7[%c2, %c0_9], %16 {strides = array<i32>} : memref<8x256xf32, #tpu.memory_space<vmem>>, vector<1x256xf32>,
    %18 = vector.extract_strided_slice %1 {offsets = [3, 0], sizes = [1, 256], strides = [1, 1]} : vector<8x256xf32> to vector<1x256xf32>
    %19 = math.exp %18 : vector<1x256xf32>
    %20 = arith.index_cast %arg1 : i32 to index
    %c1 = arith.constant 1 : index
    %21 = memref.load %arg3[%20, %c1] : memref<3x2xf32, #tpu.memory_space<smem>>
    %22 = vector.broadcast %21 : f32 to vector<1x256xf32>
    %23 = arith.mulf %19, %22 : vector<1x256xf32>
    %c3 = arith.constant 3 : index
    %c0_10 = arith.constant 0 : index
    %24 = vector.load %arg7[%c3, %c0_10] : memref<8x256xf32, #tpu.memory_space<vmem>>, vector<1x256xf32>
    tpu.vector_store %arg7[%c3, %c0_10], %23 {strides = array<i32>} : memref<8x256xf32, #tpu.memory_space<vmem>>, vector<1x256xf32>,
    %25 = vector.extract_strided_slice %1 {offsets = [4, 0], sizes = [4, 256], strides = [1, 1]} : vector<8x256xf32> to vector<4x256xf32>
    %cst_11 = arith.constant 5.000000e-01 : f32
    %26 = vector.broadcast %cst_11 : f32 to vector<4x256xf32>
    %27 = arith.mulf %26, %25 : vector<4x256xf32>
    %28 = math.tanh %27 : vector<4x256xf32>
    %cst_12 = arith.constant 5.000000e-01 : f32
    %29 = vector.broadcast %cst_12 : f32 to vector<4x256xf32>
    %30 = arith.mulf %29, %28 : vector<4x256xf32>
    %cst_13 = arith.constant 5.000000e-01 : f32
    %31 = vector.broadcast %cst_13 : f32 to vector<4x256xf32>
    %32 = arith.addf %30, %31 : vector<4x256xf32>
    %c4 = arith.constant 4 : index
    %c0_14 = arith.constant 0 : index
    %33 = vector.load %arg7[%c4, %c0_14] : memref<8x256xf32, #tpu.memory_space<vmem>>, vector<4x256xf32>
    tpu.vector_store %arg7[%c4, %c0_14], %32 {strides = array<i32>} : memref<8x256xf32, #tpu.memory_space<vmem>>, vector<4x256xf32>,
    %c0_15 = arith.constant 0 : index
    %c0_16 = arith.constant 0 : index
    %34 = vector.load %arg7[%c0_15, %c0_16] : memref<8x256xf32, #tpu.memory_space<vmem>>, vector<8x256xf32>
    %35 = tpu.transpose %34, [1, 0] : vector<8x256xf32> -> vector<256x8xf32>
    %c0_17 = arith.constant 0 : index
    %c0_18 = arith.constant 0 : index
    %c0_19 = arith.constant 0 : index
    %c0_20 = arith.constant 0 : index
    %36 = vector.load %arg6[%c0_17, %c0_18, %c0_19, %c0_20] : memref<1x1x256x8xf32, #tpu.memory_space<vmem>>, vector<1x1x256x8xf32>
    %37 = vector.shape_cast %36 : vector<1x1x256x8xf32> to vector<256x8xf32>
    %38 = vector.shape_cast %35 : vector<256x8xf32> to vector<1x1x256x8xf32>
    tpu.vector_store %arg6[%c0_17, %c0_18, %c0_19, %c0_20], %38 {strides = array<i32>} : memref<1x1x256x8xf32, #tpu.memory_space<vmem>>, vector<1x1x256x8xf32>,
    return
  }
  func.func @transform_0(%arg0: i32, %arg1: i32, %arg2: i32) -> (i32, i32) {
    %c0_i32 = arith.constant 0 : i32
    %c0_i32_0 = arith.constant 0 : i32
    %c0_i32_1 = arith.constant 0 : i32
    return %c0_i32, %c0_i32_0 : i32, i32
  }
  func.func @transform_1(%arg0: i32, %arg1: i32, %arg2: i32) -> (i32, i32) {
    %c0_i32 = arith.constant 0 : i32
    %c0_i32_0 = arith.constant 0 : i32
    return %c0_i32, %arg2 : i32, i32
  }
  func.func @transform_2(%arg0: i32, %arg1: i32, %arg2: i32) -> (i32, i32, i32, i32) {
    %c0_i32 = arith.constant 0 : i32
    %c0_i32_0 = arith.constant 0 : i32
    return %arg0, %arg1, %c0_i32, %arg2 : i32, i32, i32, i32
  }
  func.func @transform_3(%arg0: i32, %arg1: i32, %arg2: i32) -> (i32, i32, i32, i32) {
    %c0_i32 = arith.constant 0 : i32
    %c0_i32_0 = arith.constant 0 : i32
    return %arg0, %arg1, %arg2, %c0_i32 : i32, i32, i32, i32
  }
}

</mosaic_0001>

<bundles_post_ra>
// kernel: tpu_custom_call.1
= control target key start
LH: loop header
LB: loop body
LE: loop exit
PB: predicated region body
PF: predicated region fallthrough
CT: control target
= control target key end

     0   :  { %s1097_s0 = inlined_call_operand.vmem [shape: f32[3,2], index: 0, kind: input, shape index: {}]   ;;  %s1098_s1 = inlined_call_operand.vmem [shape: f32[2,256], index: 1, kind: input, shape index: {}]   ;;  %s1099_s2 = inlined_call_operand.hbm [shape: f32[2,3,8,256], index: 2, kind: input, shape index: {}]   ;;  %s1100_s3 = inlined_call_operand.vmem [shape: f32[2,3,256,8], index: 3, kind: output, shape index: {}]  }
   0x1   :  { %1104 = sst [smem:[#allocation9_spill]] %s1097_s0 }
   0x2   :  { %8 = vsyncpa [#allocation5], 0 }
   0x3   :  { %9 = vsyncpa [#allocation4], 0 }
   0x4   :  { %11 = vsyncpa [#allocation4 + $0x1], 0  ;;  %s864_s12 = smov 0   ;;  %s866_s13 = smov 0  }
   0x5   :  { %s868_s14 = smov 0   ;;  %s870_s15 = smov 0  }
   0x6   :  { %s872_s16 = smov 0   ;;  %s874_s17 = smov 0  }
   0x7   :  { %s876_s18 = smov 0   ;;  %s878_s19 = smov 0  }
   0x8 LB: > { %s612_s20 = sadd.s32 4294967295, %s839_s19   ;;  %p107_p0 = scmp.ne.s32.totalorder %s815_s13, %s811_s12  ;;  %s839_s19 = sphi %s878_s19, %s17_s19   ;;  %s835_s18 = sphi %s876_s18, %s1118_s18   ;;  %s831_s17 = sphi %s874_s17, %s1117_s17   ;;  %s827_s16 = sphi %s872_s16, %s1116_s16   ;;  %s823_s15 = sphi %s870_s15, %s1115_s15   ;;  %s819_s14 = sphi %s868_s14, %s1114_s14   ;;  %s815_s13 = sphi %s866_s13, %s1113_s13   ;;  %s811_s12 = sphi %s864_s12, %s1112_s12  }
   0x9   : > { %p904_p1 = scmp.eq.s32.totalorder %s612_s20, 0  ;;  %p614_p2 = scmp.ge.s32.totalorder %s839_s19, 1 }
   0xa   : > { %p148_p3 = scmp.lt.s32.totalorder %s839_s19, 7  ;;  %s1107_s0 = sld [smem:[#allocation9_spill]] }
   0xb   : > { %s1105_s21 = scalar_select %p904_p1, 1, 0 }
   0xc   : > { %p912_p4 = por %p904_p1, %p107_p0  ;;  %p919_p5 = pnand %p614_p2, %p148_p3 }
   0xd   : > { %s32_s27 = sadd.s32 1, %s831_s17 }
   0xe   : > { %s1106_s22 = scalar_select %p912_p4, 1, 0 }
   0xf   : > { %p638_p6 = pneg %p919_p5 }
  0x10   : > { %s161_s25 = sshll.u32 %s1107_s0, 4  ;;  %s162_s25 = int_to_ptr.vmem [resolvable:$true] %s161_s25 }
  0x11   : > { %p639_p7 = pnand %p638_p6, %p904_p1  ;;  %s724_s28 = scalar_lea.vmem %s162_s25, 64 }
  0x12   : > { %p725_p8 = scmp.ne.s32.totalorder %s162_s25, %s724_s28  ;;  %p732_p12 = scmp.lt.s32.totalorder %s162_s25, %s162_s25 }
  0x13   : > { %p726_p9 = pneg %p639_p7  ;;  %p733_p13 = scmp.lt.s32.totalorder %s724_s28, %s724_s28 }
  0x15   : > { %p727_p10 = pnand %p726_p9, %p725_p8  ;;  %p734_p0 = por %p733_p13, %p732_p12 }
  0x17   : > { %p728_p11 = pneg %p727_p10 }
  0x19   : > { %p735_p4 = pnand %p734_p0, %p728_p11 }
  0x1b   : > { %738 = shalt.err (!%p735_p4)
}
  0x1c   : > { %s841_s29 = smov [#allocation3]   ;;  %p34_p2 = scmp.ge.s32.totalorder %s32_s27, 3 }
  0x1d   : > { %641 = dma.vmem_to_smem (!%p639_p7), %s162_s25, 64, %s841_s29, [#allocation5]  }
  0x1e   : > { %s36_s30 = sadd.s32 1, %s835_s18  ;;  %s94_s4 = sadd.s32 1, %s819_s14 }
  0x1f   : > { %p101_p3 = scmp.ne.s32.totalorder %s819_s14, %s815_s13  ;;  %s1120_s27 = smov (%p34_p2, %s32_s27), 0 }
  0x20   : > { %s1122_s30 = smov (!%p34_p2, %s36_s30), %s835_s18  ;;  %s88_s5 = ssub.s32 %s831_s17, %s1120_s27 }
  0x21   : > { %p102_p4 = scmp.eq.s32.totalorder %s839_s19, 0  ;;  %p38_p6 = scmp.ge.s32.totalorder %s1122_s30, 2 }
  0x22   : > { %p647_p8 = scmp.lt.s32.totalorder %s839_s19, 6  ;;  %s181_s6 = sand.u32 1, %s819_s14  }
  0x23   : > { %p103_p9 = por %p102_p4, %p101_p3  ;;  %s1124_s30 = smov (%p38_p6, %s1122_s30), 0 }
  0x24   : > { %s618_s7 = sshll.u32 %s181_s6, 4  ;;  %s87_s8 = ssub.s32 %s835_s18, %s1124_s30 }
  0x25   : > { %s89_s9 = sor.u32 %s88_s5, %s87_s8  ;;  %s619_s10 = sshll.u32 %s831_s17, 1 }
  0x26   : > { %p92_p7 = scmp.eq.s32.totalorder %s89_s9, 0  ;;  %s630_s11 = smul.u32 6, %s835_s18 }
  0x27   : > { %s185_s12 = scalar_lea.vmem [#allocation6], %s618_s7  ;;  %p946_p10 = pnand %p647_p8, %p103_p9 }
  0x28   : > { %s197_s20 = sshll.u32 %s185_s12, 4  ;;  %s193_s25 = sadd.s32 %s630_s11, %s619_s10  ;;  %s953_s20 = int_to_ptr.vmem [resolvable:$true] %s197_s20 }
  0x29   : > { %s951_s24 = scalar_select %p92_p7, %s819_s14, %s94_s4  }
  0x2a   : > { %s620_s28 = sshll.u32 %s193_s25, 7  ;;  %s182_s7 = scalar_lea.sflag [#allocation4], %s181_s6 }
  0x2b   : > { %s958_s5 = scalar_lea.hbm %s1099_s2, %s620_s28  ;;  %p741_p12 = pneg %p946_p10 }
  0x2c   : > { %s739_s8 = scalar_lea.hbm %s958_s5, 256  ;;  %s744_s10 = scalar_lea.hbm %s1099_s2, 1536 }
  0x2d   : > { %p740_p11 = scmp.ne.s32.totalorder %s958_s5, %s739_s8  ;;  %p745_p2 = scmp.lt.u32.totalorder %s958_s5, %s1099_s2 }
  0x2e   : > { %p746_p3 = scmp.lt.u32.totalorder %s744_s10, %s739_s8  ;;  %p748_p6 = scmp.lt.u32.totalorder %s739_s8, %s958_s5 }
  0x2f   : > { %p742_p13 = pnand %p741_p12, %p740_p11 }
  0x30   : > { %p747_p4 = por %p746_p3, %p745_p2 }
  0x31   : > { %p743_p0 = pneg %p742_p13 }
  0x32   : > { %p749_p8 = por %p748_p6, %p747_p4 }
  0x34   : > { %p750_p9 = pnand %p749_p8, %p743_p0 }
  0x36   : > { %753 = shalt.err (!%p750_p9)
}
  0x37   : > { %s754_s6 = scalar_lea.vmem %s953_s20, 256  ;;  %s842_s12 = smov [#allocation6]  }
  0x38   : > { %p755_p7 = scmp.ne.s32.totalorder %s953_s20, %s754_s6  ;;  %s759_s25 = sshll.u32 %s842_s12, 4  ;;  %s760_s25 = int_to_ptr.vmem [resolvable:$false] %s759_s25 }
  0x39   : > { %s761_s28 = scalar_lea.vmem %s760_s25, 512  ;;  %p762_p1 = scmp.lt.s32.totalorder %s953_s20, %s760_s25 }
  0x3a   : > { %p757_p11 = pnand %p755_p7, %p741_p12  ;;  %p763_p2 = scmp.lt.s32.totalorder %s761_s28, %s754_s6 }
  0x3c   : > { %p758_p13 = pneg %p757_p11  ;;  %p764_p3 = por %p763_p2, %p762_p1 }
  0x3e   : > { %p765_p4 = pnand %p764_p3, %p758_p13 }
  0x40   : > { %768 = shalt.err (!%p765_p4)
}
  0x41   : > { %645 = dma.hbm_to_vmem [thread:$0]  (!%p946_p10), %s958_s5, 256, %s953_s20, %s182_s7  }
  0x42   : > { %206 = sbr.rel (%p919_p5) target bundleno = 370 (0x172), region = 32  ;;  %p1110_p12 = scmp.ne.s32.totalorder (!%p919_p5), %s1105_s21, 0 }
  0x49   : > { %802 = dma.done.wait (%p1110_p12), [#allocation5], 64  }
  0x4a   : > { %804 = vsyncadd (%p1110_p12), [#allocation5], 4294967232  ;;  %s212_s29 = sand.u32 1, %s815_s13   ;;  %p1111_p1 = scmp.ne.s32.totalorder %s1106_s22, 0 }
  0x4b   : > { %s623_s8 = sshll.u32 %s212_s29, 4  ;;  %s213_s4 = scalar_lea.sflag [#allocation4], %s212_s29 }
  0x4c   : > { %s216_s9 = scalar_lea.vmem [#allocation6], %s623_s8 }
  0x4d   : > { %806 = dma.done.wait (%p1111_p1), %s213_s4, 256  }
  0x4e   : > { %808 = vsyncadd (%p1111_p1), %s213_s4, 4294967040 }
  0x4f   : > { %221 = sfence }
  0x50   : > { %v274_v0 = vld [vmem:[%s216_s9] sm:$0xff]  ;;  %v275_v1 = vld [vmem:[%s216_s9 + $0x8] sm:$0xff]  ;;  %s627_s21 = sshll.u32 %s823_s15, 7  ;;  %v843_v6 = vmov 1966171168   ;;  %v313_v8 = vlaneseq  ;;  %p261_p5 = scmp.lt.s32.totalorder %s827_s16, 1 }
  0x51   : > { %v277_v2 = vmul.f32 0.5, %v274_v0  ;;  %v298_v3 = vmul.f32 1.442695, %v274_v0  ;;  %v300_v4 = vmul.f32 1.442695, %v275_v1  ;;  %s333_s26 = sadd.s32 1, %s627_s21  ;;  %v311_v7 = vunpack.c.l.s4 %v843_v6 }
  0x52   : > { %v278_v5 = vmul.f32 0.5, %v275_v1  ;;  %s303_s20 = sld [smem:[#allocation3 + %s627_s21]]  ;;  %v314_v10 = vshrl.u32 %v313_v8, 7  ;;  %vm328_vm0 = vcmp.lt.s32.totalorder %v313_v8, 256  ;;  %p263_p10 = scmp.lt.s32.totalorder %s823_s15, 2  ;;  %vm433_vm1 = vcmask 64512  }
  0x53   : > { %716 = vtanh.f32 %v277_v2  ;;  %s334_s23 = sld [smem:[#allocation3 + %s333_s26]]  ;;  %v312_v9 = vunpack.c.0.s8 %v311_v7  ;;  %v626_v14 = vld.sshfl [vmem:[%s1098_s1] sm:$0x33 pattern:$0x76325410]  ;;  %s1126_s16 = smov (!%p261_p5, %s827_s16), 1 }
  0x54   : > { %718 = vpow2.f32 %v298_v3  ;;  %v291_v19 = vcombine.high %v626_v14, %v626_v14  ;;  %s1128_s15 = smov (!%p263_p10, %s823_s15), 2  ;;  %s631_s7 = smul.u32 96, %s1126_s16 }
  0x55   : > { %720 = vpow2.f32 %v300_v4  ;;  %v315_v21 = vsub.s32 %v312_v9, %v314_v10  ;;  %s624_s10 = sshll.u32 %s1128_s15, 5 }
  0x56   : > { %722 = vtanh.f32 %v278_v5  ;;  %s270_s0 = sadd.s32 %s631_s7, %s624_s10 }
  0x57   : > { %s625_s11 = sshll.u32 %s270_s0, 3 }
  0x58   : > { %v304_v11 = vstv %s303_s20  ;;  %s1007_s25 = scalar_lea.vmem %s1100_s3, %s625_s11 }
  0x59   : > { %v335_v12 = vstv %s334_s23 }
  0x5d   : > { %v717_v13 = vpop.eup %716 }
  0x5e   : > { %v719_v15 = vpop.eup %718  ;;  %v281_v16 = vmul.f32 32.0, %v717_v13  ;;  %v361_v17 = vmul.f32 0.5, %v717_v13 }
  0x5f   : > { %v721_v18 = vpop.eup %720  ;;  %v305_v20 = vmul.f32 %v719_v15, %v304_v11  ;;  %v336_v22 = vmul.f32 %v719_v15, %v335_v12 }
  0x60   : > { %v723_v23 = vpop.eup %722  ;;  %v294_v24 = vadd.f32 %v626_v14, %v281_v16  ;;  %v306_v25 = vmul.f32 %v721_v18, %v304_v11  ;;  %v337_v26 = vmul.f32 %v721_v18, %v335_v12  ;;  %v363_v27 = vadd.f32 0.5, %v361_v17 }
  0x61   : > { %v282_v28 = vmul.f32 32.0, %v723_v23  ;;  %v362_v29 = vmul.f32 0.5, %v723_v23 }
  0x62   : > { %296 = vst [vmem:[#allocation2] sm:$0x3] %v294_v24  ;;  %v309_v30 = vcombine.low %v305_v20, %v306_v25  ;;  %v340_v31 = vcombine.low %v336_v22, %v337_v26  ;;  %365 = vst [vmem:[#allocation2] sm:$0xf0] %v363_v27 }
  0x63   : > { %v295_v32 = vadd.f32 %v291_v19, %v282_v28  ;;  %v364_v33 = vadd.f32 0.5, %v362_v29 }
  0x64   : > { %v316_v34 = vrot.slane %v309_v30, %v315_v21  ;;  %v347_v35 = vrot.slane %v340_v31, %v315_v21 }
  0x65   : > { %297 = vst [vmem:[#allocation2 + $0x8] sm:$0x3] %v295_v32  ;;  %366 = vst [vmem:[#allocation2 + $0x8] sm:$0xf0] %v364_v33 }
  0x66   : > { %v323_v36 = vrot.slane %v316_v34, %v315_v21  ;;  %v348_v37 = vcombine.high %v347_v35, %v347_v35 }
  0x68   : > { %v324_v38 = vcombine.high %v323_v36, %v323_v36  ;;  %v355_v39 = vrot.slane %v348_v37, %v315_v21 }
  0x6a   : > { %331 = vst.msk [vmem:[#allocation2 + $0x2] ss:$8 sm:$0x3] %vm328_vm0, %v324_v38  ;;  %v356_v40 = vcombine.high %v355_v39, %v355_v39 }
  0x6c   : > { %359 = vst.msk [vmem:[#allocation2 + $0x3] ss:$8 sm:$0x3] %vm328_vm0, %v356_v40 }
  0x73   : > { %v367_v41 = vld [vmem:[#allocation2] sm:$0xff]  ;;  %v368_v42 = vld [vmem:[#allocation2 + $0x8] sm:$0xff] }
  0x74   : > { %369 = vxpose.xlu0.b32.start.end [1/1] (short) %v367_v41, 128 }
  0xb1   : > { %401 = vxpose.xlu0.b32.start.end [1/1] (short) %v368_v42, 128 }
  0xf4   : > { %v385_v43 = vpop.trf.xlu0 }
  0xf5   : > { %434 = vst.msk [vmem:[%s1007_s25] sm:$0xff] %vm433_vm1, %v385_v43 }
  0xf8   : > { %v386_v44 = vpop.trf.xlu0 }
  0xf9   : > { %435 = vst.msk [vmem:[%s1007_s25 + $0x8] sm:$0xff] %vm433_vm1, %v386_v44 }
  0xfc   : > { %v387_v45 = vpop.trf.xlu0 }
  0xfd   : > { %436 = vst.msk [vmem:[%s1007_s25 + $0x10] sm:$0xff] %vm433_vm1, %v387_v45 }
 0x100   : > { %v388_v46 = vpop.trf.xlu0 }
 0x101   : > { %437 = vst.msk [vmem:[%s1007_s25 + $0x18] sm:$0xff] %vm433_vm1, %v388_v46 }
 0x104   : > { %v389_v47 = vpop.trf.xlu0 }
 0x105   : > { %438 = vst.msk [vmem:[%s1007_s25 + $0x20] sm:$0xff] %vm433_vm1, %v389_v47 }
 0x108   : > { %v390_v48 = vpop.trf.xlu0 }
 0x109   : > { %439 = vst.msk [vmem:[%s1007_s25 + $0x28] sm:$0xff] %vm433_vm1, %v390_v48 }
 0x10c   : > { %v391_v49 = vpop.trf.xlu0 }
 0x10d   : > { %440 = vst.msk [vmem:[%s1007_s25 + $0x30] sm:$0xff] %vm433_vm1, %v391_v49 }
 0x110   : > { %v392_v50 = vpop.trf.xlu0 }
 0x111   : > { %441 = vst.msk [vmem:[%s1007_s25 + $0x38] sm:$0xff] %vm433_vm1, %v392_v50 }
 0x114   : > { %v393_v51 = vpop.trf.xlu0 }
 0x115   : > { %442 = vst.msk [vmem:[%s1007_s25 + $0x40] sm:$0xff] %vm433_vm1, %v393_v51 }
 0x118   : > { %v394_v52 = vpop.trf.xlu0 }
 0x119   : > { %443 = vst.msk [vmem:[%s1007_s25 + $0x48] sm:$0xff] %vm433_vm1, %v394_v52 }
 0x11c   : > { %v395_v53 = vpop.trf.xlu0 }
 0x11d   : > { %444 = vst.msk [vmem:[%s1007_s25 + $0x50] sm:$0xff] %vm433_vm1, %v395_v53 }
 0x120   : > { %v396_v54 = vpop.trf.xlu0 }
 0x121   : > { %445 = vst.msk [vmem:[%s1007_s25 + $0x58] sm:$0xff] %vm433_vm1, %v396_v54 }
 0x124   : > { %v397_v55 = vpop.trf.xlu0 }
 0x125   : > { %446 = vst.msk [vmem:[%s1007_s25 + $0x60] sm:$0xff] %vm433_vm1, %v397_v55 }
 0x128   : > { %v398_v56 = vpop.trf.xlu0 }
 0x129   : > { %447 = vst.msk [vmem:[%s1007_s25 + $0x68] sm:$0xff] %vm433_vm1, %v398_v56 }
 0x12c   : > { %v399_v57 = vpop.trf.xlu0 }
 0x12d   : > { %448 = vst.msk [vmem:[%s1007_s25 + $0x70] sm:$0xff] %vm433_vm1, %v399_v57 }
 0x130   : > { %v400_v58 = vpop.trf.xlu0 }
 0x131   : > { %449 = vst.msk [vmem:[%s1007_s25 + $0x78] sm:$0xff] %vm433_vm1, %v400_v58 }
 0x134   : > { %v417_v59 = vpop.trf.xlu0 }
 0x135   : > { %450 = vst.msk [vmem:[%s1007_s25 + $0x80] sm:$0xff] %vm433_vm1, %v417_v59 }
 0x138   : > { %v418_v60 = vpop.trf.xlu0 }
 0x139   : > { %451 = vst.msk [vmem:[%s1007_s25 + $0x88] sm:$0xff] %vm433_vm1, %v418_v60 }
 0x13c   : > { %v419_v61 = vpop.trf.xlu0 }
 0x13d   : > { %452 = vst.msk [vmem:[%s1007_s25 + $0x90] sm:$0xff] %vm433_vm1, %v419_v61 }
 0x140   : > { %v420_v62 = vpop.trf.xlu0 }
 0x141   : > { %453 = vst.msk [vmem:[%s1007_s25 + $0x98] sm:$0xff] %vm433_vm1, %v420_v62 }
 0x144   : > { %v421_v63 = vpop.trf.xlu0 }
 0x145   : > { %454 = vst.msk [vmem:[%s1007_s25 + $0xa0] sm:$0xff] %vm433_vm1, %v421_v63 }
 0x148   : > { %v422_v0 = vpop.trf.xlu0 }
 0x149   : > { %455 = vst.msk [vmem:[%s1007_s25 + $0xa8] sm:$0xff] %vm433_vm1, %v422_v0 }
 0x14c   : > { %v423_v1 = vpop.trf.xlu0 }
 0x14d   : > { %456 = vst.msk [vmem:[%s1007_s25 + $0xb0] sm:$0xff] %vm433_vm1, %v423_v1 }
 0x150   : > { %v424_v2 = vpop.trf.xlu0 }
 0x151   : > { %457 = vst.msk [vmem:[%s1007_s25 + $0xb8] sm:$0xff] %vm433_vm1, %v424_v2 }
 0x154   : > { %v425_v3 = vpop.trf.xlu0 }
 0x155   : > { %458 = vst.msk [vmem:[%s1007_s25 + $0xc0] sm:$0xff] %vm433_vm1, %v425_v3 }
 0x158   : > { %v426_v4 = vpop.trf.xlu0 }
 0x159   : > { %459 = vst.msk [vmem:[%s1007_s25 + $0xc8] sm:$0xff] %vm433_vm1, %v426_v4 }
 0x15c   : > { %v427_v5 = vpop.trf.xlu0 }
 0x15d   : > { %460 = vst.msk [vmem:[%s1007_s25 + $0xd0] sm:$0xff] %vm433_vm1, %v427_v5 }
 0x160   : > { %v428_v6 = vpop.trf.xlu0 }
 0x161   : > { %461 = vst.msk [vmem:[%s1007_s25 + $0xd8] sm:$0xff] %vm433_vm1, %v428_v6 }
 0x164   : > { %v429_v7 = vpop.trf.xlu0 }
 0x165   : > { %462 = vst.msk [vmem:[%s1007_s25 + $0xe0] sm:$0xff] %vm433_vm1, %v429_v7 }
 0x168   : > { %v430_v8 = vpop.trf.xlu0 }
 0x169   : > { %463 = vst.msk [vmem:[%s1007_s25 + $0xe8] sm:$0xff] %vm433_vm1, %v430_v8 }
 0x16c   : > { %v431_v9 = vpop.trf.xlu0 }
 0x16d   : > { %464 = vst.msk [vmem:[%s1007_s25 + $0xf0] sm:$0xff] %vm433_vm1, %v431_v9 }
 0x170   : > { %v432_v10 = vpop.trf.xlu0 }
 0x171   : > { %465 = vst.msk [vmem:[%s1007_s25 + $0xf8] sm:$0xff] %vm433_vm1, %v432_v10 }
 0x172 PF: > { %s17_s19 = sadd.s32 1, %s839_s19   ;;  %s1112_s12 = smov %s815_s13 }
 0x173   : > { %p14_p0 = scmp.ge.s32.totalorder %s17_s19, 8   ;;  %s1113_s13 = smov %s819_s14 }
 0x174   : > { %s1114_s14 = smov %s951_s24  ;;  %s1115_s15 = smov %s831_s17 }
 0x175   : > { %s1116_s16 = smov %s835_s18  ;;  %s1117_s17 = smov %s1120_s27 }
 0x176   : > { %s1118_s18 = smov %s1124_s30  ;;  %16 = sbr.rel (!%p14_p0) target bundleno = 8 (0x8), region = 82 }
 0x17d   :  { %504 = vsyncpa [#allocation4], 1 }
 0x17e   :  { %506 = vsyncpa [#allocation4 + $0x1], 1 }
 0x17f   :  { %507 = vsyncpa [#allocation5], 1 }
 0x180   :  { %509 = vsyncpa [#allocation5 + $0x1], 1 }

</bundles_post_ra>
